<compile_context>
chip_gen: v5e
topology: v5e:2x2
jax: 0.10.0
libtpu: 0.0.40
codegen_flags: <defaults>
</compile_context>

<pallas_src>
import functools

import jax
import jax.numpy as jnp
from jax.experimental import pallas as pl
from jax.experimental.pallas import tpu as pltpu


# ------------------------------ Pallas kernels ------------------------------

def _pre1_kernel(feat_ref, attr_ref, w1f_ref, w1a_ref, b1_ref, o_ref):
    """Per-source part of src_fc layer 1: feat@W1f + attr@W1a + b1 (pre-act)."""
    o_ref[...] = (jnp.dot(feat_ref[...], w1f_ref[...],
                          preferred_element_type=jnp.float32)
                  + jnp.dot(attr_ref[...], w1a_ref[...],
                            preferred_element_type=jnp.float32)
                  + b1_ref[...])


def _edge_agg_kernel(occ_ref, pre1_ref, dist_ref, mask_ref, mu_ref,
                     w1e_ref, w2_ref, b2_ref, w3_ref, b3_ref,
                     w4_ref, b4_ref, o_ref, acc_ref, deg_ref, *, coeff):
    """Fused per-layer edge path for one (dst block, src block) grid point.

      rbf = exp(-coeff * (dist - mu)^2)                        (RBF smearing)
      h3  = MLP layers 1..3 on cat([feat[src], attr[src], rbf])
            (per-src part pre1 is hoisted; only rbf@W1e is per-edge)
      acc[dst] += sum_src mask[src, dst] * h3                  (scatter-sum)
      deg[dst] += sum_src mask[src, dst]
    and at the last src block (W4-linearity hoist):
      out[dst] = acc[dst] @ W4 + deg[dst] * b4
    All-zero adjacency blocks (from the SMEM occupancy table) are skipped.
    """
    di = pl.program_id(0)
    si = pl.program_id(1)
    n_s = pl.num_programs(1)

    @pl.when(si == 0)
    def _init():
        acc_ref[...] = jnp.zeros_like(acc_ref)
        deg_ref[...] = jnp.zeros_like(deg_ref)

    @pl.when(occ_ref[di * n_s + si] > 0)
    def _body():
        s_blk, d_blk = dist_ref.shape
        h_dim = w1e_ref.shape[1]

        # Gaussian RBF smearing, edge-flattened (never written to HBM).
        # TODO(synk): exact get_dist_embed impl not given; Gaussian smearing assumed.
        dist_flat = dist_ref[...].reshape(s_blk * d_blk, 1)
        diff = dist_flat - mu_ref[...]
        rbf = jnp.exp(-coeff * diff * diff)

        # src_fc layer 1: edge-dependent part + hoisted per-src part, then GELU.
        # TODO(synk): MLP class body not provided; hidden activation assumed GELU (tanh approx).
        h = jnp.dot(rbf.astype(jnp.bfloat16), w1e_ref[...],
                    preferred_element_type=jnp.float32)
        h = h.reshape(s_blk, d_blk, h_dim) + pre1_ref[...][:, None, :]
        h = jax.nn.gelu(h, approximate=True).reshape(s_blk * d_blk, h_dim)
        # src_fc layers 2..3 (bf16 operands, f32 accumulation).
        h = jax.nn.gelu(jnp.dot(h.astype(jnp.bfloat16), w2_ref[...],
                                preferred_element_type=jnp.float32) + b2_ref[...],
                        approximate=True)
        h = jax.nn.gelu(jnp.dot(h.astype(jnp.bfloat16), w3_ref[...],
                                preferred_element_type=jnp.float32) + b3_ref[...],
                        approximate=True)

        # Mask non-edges and scatter-sum over src (layer 4 hoisted out).
        h3 = h.reshape(s_blk, d_blk, h_dim) * mask_ref[...][:, :, None]
        acc_ref[...] += jnp.sum(h3, axis=0)
        deg_ref[...] += jnp.sum(mask_ref[...], axis=0, keepdims=True)

    @pl.when(si == n_s - 1)
    def _write():
        o_ref[...] = (jnp.dot(acc_ref[...], w4_ref[...],
                              preferred_element_type=jnp.float32)
                      + deg_ref[...].T * b4_ref[...])


def _node_layer_kernel(attr_ref, feat_ref, agg_ref,
                       dw1, db1, dw2, db2, dw3, db3, dw4, db4,
                       fw1, fb1, fw2, fb2, fw3, fb3, fw4, fb4,
                       wa_ref, wb_ref, wc_ref, fcb_ref, o_ref):
    """Fused dst_fc(node_attr), feat_fc(node_feat) and the final Linear over
    cat([dst_attr, dst_feat, agg]) (expressed as split matmuls)."""

    def mlp4(x, w1, b1, w2, b2, w3, b3, w4, b4):
        h = jnp.dot(x.astype(jnp.bfloat16), w1[...],
                    preferred_element_type=jnp.float32) + b1[...]
        h = jax.nn.gelu(h, approximate=True)
        h = jnp.dot(h.astype(jnp.bfloat16), w2[...],
                    preferred_element_type=jnp.float32) + b2[...]
        h = jax.nn.gelu(h, approximate=True)
        h = jnp.dot(h.astype(jnp.bfloat16), w3[...],
                    preferred_element_type=jnp.float32) + b3[...]
        h = jax.nn.gelu(h, approximate=True)
        return jnp.dot(h.astype(jnp.bfloat16), w4[...],
                       preferred_element_type=jnp.float32) + b4[...]

    dst_attr = mlp4(attr_ref[...], dw1, db1, dw2, db2, dw3, db3, dw4, db4)
    dst_feat = mlp4(feat_ref[...], fw1, fb1, fw2, fb2, fw3, fb3, fw4, fb4)
    # Final fc: tiny 16-wide contractions kept in f32 for accuracy.
    o_ref[...] = (jnp.dot(dst_attr, wa_ref[...], preferred_element_type=jnp.float32)
                  + jnp.dot(dst_feat, wb_ref[...], preferred_element_type=jnp.float32)
                  + jnp.dot(agg_ref[...], wc_ref[...], preferred_element_type=jnp.float32)
                  + fcb_ref[...])


# ------------------------------ kernel wrappers ------------------------------

def _round_up(x, m):
    return ((x + m - 1) // m) * m


def _device_kind():
    try:
        return jax.devices()[0].device_kind.lower()
    except Exception:
        return ""


def _edge_src_block(n_pad, dst_blk, r_dim, hid, kind):
    """Reduction tile over source nodes: largest power-of-two multiple of 8
    dividing n_pad that keeps per-step intermediates within a per-chip VMEM
    budget (smaller on v7x: 64 MiB physical, 2 TCs)."""
    is_v7 = "v7" in kind
    cap = 64 if is_v7 else 256
    budget = (12 if is_v7 else 28) * 1024 * 1024
    per_edge = 4 * (r_dim + 5 * hid)        # rough live f32 bytes per edge
    max_src = max(budget // (per_edge * dst_blk), 8)
    for cand in (256, 128, 64, 32, 16, 8):
        if cand <= cap and cand <= max_src and n_pad % cand == 0:
            return cand
    return 8


def compute_pre1(feat, node_attr, w1f, w1a, b1, *, row_blk):
    """Per-layer hoist of the source-node-only part of src_fc layer 1."""
    n_pad, g = feat.shape
    a = node_attr.shape[1]
    h = w1f.shape[1]

    def row_map(i):
        return (i, 0)

    def w_map(i):
        return (0, 0)

    return pl.pallas_call(
        _pre1_kernel,
        out_shape=jax.ShapeDtypeStruct((n_pad, h), jnp.float32),
        grid=(n_pad // row_blk,),
        in_specs=[pl.BlockSpec((row_blk, g), row_map),
                  pl.BlockSpec((row_blk, a), row_map),
                  pl.BlockSpec(w1f.shape, w_map),
                  pl.BlockSpec(w1a.shape, w_map),
                  pl.BlockSpec(b1.shape, w_map)],
        out_specs=pl.BlockSpec((row_blk, h), row_map),
        compiler_params=pltpu.CompilerParams(dimension_semantics=("parallel",)),
    )(feat, node_attr, w1f, w1a, b1)


def edge_aggregate(pre1, dist, adj, occ, centers, coeff, edge_weights,
                   *, src_blk, dst_blk, vmem_limit_bytes):
    """One fused pallas_call: RBF -> src_fc MLP (layers 1-3) -> mask ->
    scatter-sum over src, with W4/b4 applied once per dst block."""
    n_pad = dist.shape[0]
    w1e, w2, b2, w3, b3, w4, b4 = edge_weights
    g = w4.shape[1]
    h = w1e.shape[1]
    n_d, n_s = n_pad // dst_blk, n_pad // src_blk

    def src_map(di, si, occ_r):
        return (si, 0)

    def edge_map(di, si, occ_r):          # dist / mask are [src, dst]
        return (si, di)

    def w_map(di, si, occ_r):
        return (0, 0)

    def out_map(di, si, occ_r):           # constant along si -> accumulator
        return (di, 0)

    weights = [centers, w1e, w2, b2, w3, b3, w4, b4]
    in_specs = [
        pl.BlockSpec((src_blk, h), src_map),         # hoisted pre1[src]
        pl.BlockSpec((src_blk, dst_blk), edge_map),  # dist
        pl.BlockSpec((src_blk, dst_blk), edge_map),  # adjacency mask (f32)
    ] + [pl.BlockSpec(t.shape, w_map) for t in weights]

    return pl.pallas_call(
        functools.partial(_edge_agg_kernel, coeff=coeff),
        out_shape=jax.ShapeDtypeStruct((n_pad, g), jnp.float32),
        grid_spec=pltpu.PrefetchScalarGridSpec(
            num_scalar_prefetch=1,
            grid=(n_d, n_s),
            in_specs=in_specs,
            out_specs=pl.BlockSpec((dst_blk, g), out_map),
            scratch_shapes=[pltpu.VMEM((dst_blk, h), jnp.float32),
                            pltpu.VMEM((1, dst_blk), jnp.float32)],
        ),
        compiler_params=pltpu.CompilerParams(
            dimension_semantics=("parallel", "arbitrary"),
            vmem_limit_bytes=vmem_limit_bytes,
        ),
    )(occ, pre1, dist, adj, *weights)


def node_update(node_attr, feat, agg, dst_params, feat_params, fc_params, *, row_blk):
    """One fused pallas_call: dst_fc + feat_fc + final fc over node-row tiles."""
    n_pad, a = node_attr.shape
    g = feat.shape[1]
    w, bias = fc_params
    # Split fc weight rows to match cat([dst_attr, dst_feat, agg], -1).
    w_a, w_b, w_c = w[:g], w[g:2 * g], w[2 * g:]

    def flat_bf16(p):
        out = []
        for (wi, bi) in p:
            out += [wi.astype(jnp.bfloat16), bi]
        return out

    flat = flat_bf16(dst_params) + flat_bf16(feat_params) + [w_a, w_b, w_c, bias]

    def row_map(i):
        return (i, 0)

    def w_map(i):
        return (0, 0)

    in_specs = [pl.BlockSpec((row_blk, a), row_map),
                pl.BlockSpec((row_blk, g), row_map),
                pl.BlockSpec((row_blk, g), row_map)]
    in_specs += [pl.BlockSpec(t.shape, w_map) for t in flat]

    return pl.pallas_call(
        _node_layer_kernel,
        out_shape=jax.ShapeDtypeStruct((n_pad, g), jnp.float32),
        grid=(n_pad // row_blk,),
        in_specs=in_specs,
        out_specs=pl.BlockSpec((row_blk, g), row_map),
        compiler_params=pltpu.CompilerParams(dimension_semantics=("parallel",)),
    )(node_attr, feat, agg, *flat)


# --------------------------- parameter init (glue) ---------------------------

def _linear_init(key, fan_in, fan_out):
    kw, kb = jax.random.split(key)
    bound = 1.0 / (fan_in ** 0.5)
    w = jax.random.uniform(kw, (fan_in, fan_out), jnp.float32, -bound, bound)
    b = jax.random.uniform(kb, (1, fan_out), jnp.float32, -bound, bound)
    return w, b


def _mlp_init(key, d_in, hidden, d_out):
    dims = [d_in] + list(hidden) + [d_out]
    keys = jax.random.split(key, len(dims) - 1)
    return [_linear_init(k, dims[i], dims[i + 1]) for i, k in enumerate(keys)]


def init_gcn_encoder_params(key, cfg):
    g = cfg["n_gauss"]
    a = cfg["atom_embed_size"] + cfg["time_embed_size"]  # node_in_size
    r = cfg["radial_embed_size"]
    h = cfg["hidden_size"]
    k_embed, k_layers = jax.random.split(key)
    params = {
        "atom_embedding": jax.random.normal(
            k_embed, (cfg["n_atom_type"], cfg["atom_embed_size"]), jnp.float32),
        "gcns": [],
    }
    for lk in jax.random.split(k_layers, cfg["num_gcn_layer"]):
        k1, k2, k3, k4 = jax.random.split(lk, 4)
        params["gcns"].append({
            "src_fc": _mlp_init(k1, g + a + r, [h, 2 * h, h], g),
            "dst_fc": _mlp_init(k2, a, [h, 2 * h, h], g),
            "feat_fc": _mlp_init(k3, g, [h, 2 * h, h], g),
            "fc": _linear_init(k4, 3 * g, g),
        })
    return params


# ------------------------------- forward pass -------------------------------

def gcn_encoder_forward(params, atom_types, atom_coord, batch, cfg):
    n = atom_types.shape[0]
    g = cfg["n_gauss"]
    r = cfg["radial_embed_size"]
    hid = cfg["hidden_size"]
    cutoff = cfg["cutoff"]

    # --- per-generation tiling / VMEM limits -------------------------------
    kind = _device_kind()
    n_pad = max(_round_up(n, 128), 128)
    dst_blk = 128                                  # lane-dense dist/mask tiles
    src_blk = _edge_src_block(n_pad, dst_blk, r, hid, kind)
    row_blk = 128
    vmem_limit = (32 if "v7" in kind else 64) * 1024 * 1024

    # --- node features / attributes (padded) -------------------------------
    # node_feat=None -> zeros; timestep=None -> no time embedding
    node_feat = jnp.zeros((n_pad, g), jnp.float32)
    node_attr = jnp.take(params["atom_embedding"], atom_types, axis=0)       # [N, A]
    node_attr = jnp.pad(node_attr, ((0, n_pad - n), (0, 0)))

    coord_p = jnp.pad(atom_coord, ((0, n_pad - n), (0, 0)))
    # Padded nodes get unique negative batch ids -> no edges touch them.
    batch_p = jnp.concatenate(
        [batch.astype(jnp.int32), -1 - jnp.arange(n_pad - n, dtype=jnp.int32)])

    # radius_graph (dense): ordered pairs (src, dst), s != d, same batch, dist < cutoff
    diff = coord_p[:, None, :] - coord_p[None, :, :]                          # [Np, Np, 3]
    dist = jnp.sqrt(jnp.sum(diff * diff, axis=-1))                            # [Np, Np] (src, dst)
    adj = ((batch_p[:, None] == batch_p[None, :])
           & (~jnp.eye(n_pad, dtype=bool))
           & (dist < cutoff)).astype(jnp.float32)                             # [Np, Np]
    # TODO(synk): radius_graph's max_num_neighbors cap (default 32) is not modeled.

    # Block occupancy of adj for the block-sparse skip (SMEM scalar prefetch).
    n_d, n_s = n_pad // dst_blk, n_pad // src_blk
    occ = (adj.reshape(n_s, src_blk, n_d, dst_blk).sum(axis=(1, 3)) > 0)
    occ = occ.T.reshape(-1).astype(jnp.int32)            # indexed by di*n_s+si

    # Gaussian RBF parameters for get_dist_embed over [0, cutoff].
    centers = jnp.linspace(0.0, cutoff, r).astype(jnp.float32).reshape(1, r)
    delta = cutoff / (r - 1)
    coeff = 0.5 / (delta * delta)

    feat = node_feat
    num_layers = len(params["gcns"])
    for li, lp in enumerate(params["gcns"]):
        (w1, b1), (w2, b2), (w3, b3), (w4, b4) = lp["src_fc"]
        a = node_attr.shape[1]
        # Split src_fc W1 rows to match cat([node_feat, node_attr, edge_attr]).
        w1f, w1a, w1e = w1[:g], w1[g:g + a], w1[g + a:]

        # Hoisted per-src part of src_fc layer 1 (computed once per layer).
        pre1 = compute_pre1(feat, node_attr, w1f, w1a, b1, row_blk=row_blk)   # [Np, H]

        edge_weights = (w1e.astype(jnp.bfloat16),
                        w2.astype(jnp.bfloat16), b2,
                        w3.astype(jnp.bfloat16), b3,
                        w4, b4)
        # Fused: RBF smear -> src_fc MLP -> adjacency mask -> scatter-sum over src.
        agg = edge_aggregate(pre1, dist, adj, occ, centers, coeff, edge_weights,
                             src_blk=src_blk, dst_blk=dst_blk,
                             vmem_limit_bytes=vmem_limit)                     # [Np, G]
        # Fused: dst_fc + feat_fc + final Linear over the concat.
        feat = node_update(node_attr, feat, agg,
                           lp["dst_fc"], lp["feat_fc"], lp["fc"],
                           row_blk=row_blk)                                   # [Np, G]
        if li != num_layers - 1:
            feat = jax.nn.gelu(feat, approximate=False)  # encoder nn.GELU() (exact erf)
    return feat[:n]


# ----------------------------------- main -----------------------------------

if __name__ == "__main__":
    cfg = dict(
        n_atom_type=5,
        n_gauss=16,
        atom_embed_size=32,
        radial_embed_size=32,
        hidden_size=64,
        num_gcn_layer=2,
        cutoff=5.0,
        time_embed_size=0,
    )
    n_atoms = 16

    key = jax.random.PRNGKey(0)
    k_types, k_coord, k_params = jax.random.split(key, 3)
    atom_types = jax.random.randint(k_types, (n_atoms,), 0, cfg["n_atom_type"], dtype=jnp.int32)
    atom_coord = jax.random.uniform(k_coord, (n_atoms, 3), jnp.float32, 0.0, 3.0)
    batch = jnp.concatenate([
        jnp.zeros(n_atoms // 2, jnp.int32),
        jnp.ones(n_atoms - n_atoms // 2, jnp.int32),
    ])

    params = init_gcn_encoder_params(k_params, cfg)
    out = gcn_encoder_forward(params, atom_types, atom_coord, batch, cfg)
    out = jax.block_until_ready(out)
    assert out.shape == (n_atoms, cfg["n_gauss"]), out.shape
    assert bool(jnp.all(jnp.isfinite(out)))
    print("KERNEL_OK")
</pallas_src>

<mosaic_0001>
module attributes {stable_mosaic.version = 11 : i64} {
  func.func @_pre1_kernel(%arg0: i32, %arg1: memref<128x16xf32, #tpu.memory_space<vmem>>, %arg2: memref<128x32xf32, #tpu.memory_space<vmem>>, %arg3: memref<16x64xf32, #tpu.memory_space<vmem>>, %arg4: memref<32x64xf32, #tpu.memory_space<vmem>>, %arg5: memref<1x64xf32, #tpu.memory_space<vmem>>, %arg6: memref<128x64xf32, #tpu.memory_space<vmem>>) attributes {dimension_semantics = [#tpu.dimension_semantics<parallel>], iteration_bounds = array<i64: 1>, scalar_prefetch = 0 : i64, scratch_operands = 0 : i64, tpu.core_type = #tpu.core_type<tc>, window_params = [{transform_indices = @transform_0, window_bounds = array<i64: 128, 16>}, {transform_indices = @transform_1, window_bounds = array<i64: 128, 32>}, {pipeline_mode = #tpu.pipeline_mode<synchronous>, transform_indices = @transform_2, window_bounds = array<i64: 16, 64>}, {pipeline_mode = #tpu.pipeline_mode<synchronous>, transform_indices = @transform_3, window_bounds = array<i64: 32, 64>}, {pipeline_mode = #tpu.pipeline_mode<synchronous>, transform_indices = @transform_4, window_bounds = array<i64: 1, 64>}, {transform_indices = @transform_5, window_bounds = array<i64: 128, 64>}]} {
    %c0 = arith.constant 0 : index
    %c0_0 = arith.constant 0 : index
    %0 = vector.load %arg1[%c0, %c0_0] : memref<128x16xf32, #tpu.memory_space<vmem>>, vector<128x16xf32>
    %c0_1 = arith.constant 0 : index
    %c0_2 = arith.constant 0 : index
    %1 = vector.load %arg3[%c0_1, %c0_2] : memref<16x64xf32, #tpu.memory_space<vmem>>, vector<16x64xf32>
    %cst = arith.constant dense<0.000000e+00> : vector<128x64xf32>
    %2 = tpu.matmul %0, %1, %cst {dimension_numbers = #tpu.dot_dimension_numbers<[1], [0], [0], [1], [0, 0, 1, 1], [], []>} : vector<128x16xf32>, vector<16x64xf32>, vector<128x64xf32> -> vector<128x64xf32>
    %c0_3 = arith.constant 0 : index
    %c0_4 = arith.constant 0 : index
    %3 = vector.load %arg2[%c0_3, %c0_4] : memref<128x32xf32, #tpu.memory_space<vmem>>, vector<128x32xf32>
    %c0_5 = arith.constant 0 : index
    %c0_6 = arith.constant 0 : index
    %4 = vector.load %arg4[%c0_5, %c0_6] : memref<32x64xf32, #tpu.memory_space<vmem>>, vector<32x64xf32>
    %cst_7 = arith.constant dense<0.000000e+00> : vector<128x64xf32>
    %5 = tpu.matmul %3, %4, %cst_7 {dimension_numbers = #tpu.dot_dimension_numbers<[1], [0], [0], [1], [0, 0, 1, 1], [], []>} : vector<128x32xf32>, vector<32x64xf32>, vector<128x64xf32> -> vector<128x64xf32>
    %6 = arith.addf %2, %5 : vector<128x64xf32>
    %c0_8 = arith.constant 0 : index
    %c0_9 = arith.constant 0 : index
    %7 = vector.load %arg5[%c0_8, %c0_9] : memref<1x64xf32, #tpu.memory_space<vmem>>, vector<1x64xf32>
    %8 = vector.broadcast %7 : vector<1x64xf32> to vector<128x64xf32>
    %9 = arith.addf %6, %8 : vector<128x64xf32>
    %c0_10 = arith.constant 0 : index
    %c0_11 = arith.constant 0 : index
    %10 = vector.load %arg6[%c0_10, %c0_11] : memref<128x64xf32, #tpu.memory_space<vmem>>, vector<128x64xf32>
    tpu.vector_store %arg6[%c0_10, %c0_11], %9 {strides = array<i32>} : memref<128x64xf32, #tpu.memory_space<vmem>>, vector<128x64xf32>,
    return
  }
  func.func @transform_0(%arg0: i32) -> (i32, i32) {
    %c0_i32 = arith.constant 0 : i32
    %c0_i32_0 = arith.constant 0 : i32
    return %arg0, %c0_i32 : i32, i32
  }
  func.func @transform_1(%arg0: i32) -> (i32, i32) {
    %c0_i32 = arith.constant 0 : i32
    %c0_i32_0 = arith.constant 0 : i32
    return %arg0, %c0_i32 : i32, i32
  }
  func.func @transform_2(%arg0: i32) -> (i32, i32) {
    %c0_i32 = arith.constant 0 : i32
    %c0_i32_0 = arith.constant 0 : i32
    %c0_i32_1 = arith.constant 0 : i32
    return %c0_i32, %c0_i32_0 : i32, i32
  }
  func.func @transform_3(%arg0: i32) -> (i32, i32) {
    %c0_i32 = arith.constant 0 : i32
    %c0_i32_0 = arith.constant 0 : i32
    %c0_i32_1 = arith.constant 0 : i32
    return %c0_i32, %c0_i32_0 : i32, i32
  }
  func.func @transform_4(%arg0: i32) -> (i32, i32) {
    %c0_i32 = arith.constant 0 : i32
    %c0_i32_0 = arith.constant 0 : i32
    %c0_i32_1 = arith.constant 0 : i32
    return %c0_i32, %c0_i32_0 : i32, i32
  }
  func.func @transform_5(%arg0: i32) -> (i32, i32) {
    %c0_i32 = arith.constant 0 : i32
    %c0_i32_0 = arith.constant 0 : i32
    return %arg0, %c0_i32 : i32, i32
  }
}

</mosaic_0001>

<bundles_post_ra>
// kernel: tpu_custom_call.1
= control target key start
LH: loop header
LB: loop body
LE: loop exit
PB: predicated region body
PF: predicated region fallthrough
CT: control target
= control target key end

     0   :  { %vm172_vm0 = vcmask 130048   ;;  %vm58_vm1 = vcmask 261120   ;;  %vm306_vm2 = vcmask 523264   ;;  %s630_s3 = inlined_call_operand.vmem [shape: f32[32,64], index: 3, kind: input, shape index: {}]   ;;  %s631_s2 = inlined_call_operand.vmem [shape: f32[16,64], index: 2, kind: input, shape index: {}]   ;;  %s632_s0 = inlined_call_operand.vmem [shape: f32[128,16], index: 0, kind: input, shape index: {}]   ;;  %s633_s1 = inlined_call_operand.vmem [shape: f32[128,32], index: 1, kind: input, shape index: {}]   ;;  %s634_s4 = inlined_call_operand.vmem [shape: f32[1,64], index: 4, kind: input, shape index: {}]   ;;  %s635_s5 = inlined_call_operand.vmem [shape: f32[128,64], index: 5, kind: output, shape index: {}]  }
   0x1   :  { %v57_v0 = vld [vmem:[%s630_s3 + $0x18] sm:$0xff]  ;;  %v37_v1 = vld [vmem:[%s631_s2 + $0x8] sm:$0xff]  ;;  %v56_v2 = vld [vmem:[%s630_s3 + $0x10] sm:$0xff] }
   0x2   :  { %119 = vmatpush.msra.mxu0 %v57_v0  ;;  %359 = vmatpush.msra.mxu2 %v57_v0  ;;  %v36_v3 = vld [vmem:[%s631_s2] sm:$0xff]  ;;  %v55_v5 = vld [vmem:[%s630_s3 + $0x8] sm:$0xff]  ;;  %v30_v11 = vld [vmem:[%s632_s0 + $0x50] sm:$0xff] }
   0x3   :  { %235 = vmatpush.msra.mxu1 %v37_v1  ;;  %v20_v4 = vld [vmem:[%s632_s0] sm:$0xff]  ;;  %363 = vmatpush.msra.mxu3 %v37_v1  ;;  %v29_v7 = vld [vmem:[%s632_s0 + $0x48] sm:$0xff]  ;;  %v22_v14 = vld [vmem:[%s632_s0 + $0x10] sm:$0xff] }
   0x4   :  { %120 = vmatpush.msra.mxu0 %v56_v2  ;;  %360 = vmatpush.msra.mxu2 %v56_v2  ;;  %v54_v6 = vld [vmem:[%s630_s3] sm:$0xff]  ;;  %v21_v10 = vld [vmem:[%s632_s0 + $0x8] sm:$0xff]  ;;  %v31_v15 = vld [vmem:[%s632_s0 + $0x58] sm:$0xff] }
   0x5   :  { %236 = vmatpush.msra.mxu1 %v36_v3  ;;  %364 = vmatpush.msra.mxu3 %v36_v3  ;;  %v38_v8 = vld [vmem:[%s633_s1] sm:$0xff]  ;;  %v39_v12 = vld [vmem:[%s633_s1 + $0x8] sm:$0xff]  ;;  %v40_v16 = vld [vmem:[%s633_s1 + $0x10] sm:$0xff] }
   0x6   :  { %343 = vmatmul.msk.f32.vlgmr.msra.gmra.mxu1 %vm172_vm0, %v20_v4  ;;  %121 = vmatpush.msra.mxu0 %v55_v5  ;;  %v46_v9 = vld [vmem:[%s633_s1 + $0x40] sm:$0xff]  ;;  %v47_v13 = vld [vmem:[%s633_s1 + $0x48] sm:$0xff]  ;;  %v48_v17 = vld [vmem:[%s633_s1 + $0x50] sm:$0xff] }
   0x7   :  { %361 = vmatpush.msra.mxu2 %v55_v5  ;;  %352 = vmatmul.msk.f32.vlgmr.msra.gmra.mxu3 %vm172_vm0, %v29_v7  ;;  %v23_v18 = vld [vmem:[%s632_s0 + $0x18] sm:$0xff]  ;;  %v32_v19 = vld [vmem:[%s632_s0 + $0x60] sm:$0xff]  ;;  %v33_v23 = vld [vmem:[%s632_s0 + $0x68] sm:$0xff] }
   0x8   :  { %122 = vmatpush.msra.mxu0 %v54_v6  ;;  %v41_v20 = vld [vmem:[%s633_s1 + $0x18] sm:$0xff]  ;;  %v24_v22 = vld [vmem:[%s632_s0 + $0x20] sm:$0xff]  ;;  %v25_v26 = vld [vmem:[%s632_s0 + $0x28] sm:$0xff] }
   0x9   :  { %362 = vmatpush.msra.mxu2 %v54_v6  ;;  %327 = vmatmul.msk.f32.vlgmr.msra.gmra.mxu0 %vm58_vm1, %v38_v8  ;;  %v49_v21 = vld [vmem:[%s633_s1 + $0x58] sm:$0xff]  ;;  %v42_v24 = vld [vmem:[%s633_s1 + $0x20] sm:$0xff]  ;;  %v34_v27 = vld [vmem:[%s632_s0 + $0x70] sm:$0xff] }
   0xa   :  { %335 = vmatmul.msk.f32.vlgmr.msra.gmra.mxu2 %vm58_vm1, %v46_v9  ;;  %v50_v25 = vld [vmem:[%s633_s1 + $0x60] sm:$0xff]  ;;  %v43_v28 = vld [vmem:[%s633_s1 + $0x28] sm:$0xff]  ;;  %v26_v30 = vld [vmem:[%s632_s0 + $0x30] sm:$0xff] }
   0xb   :  { %v51_v29 = vld [vmem:[%s633_s1 + $0x68] sm:$0xff]  ;;  %v35_v31 = vld [vmem:[%s632_s0 + $0x78] sm:$0xff]  ;;  %v44_v32 = vld [vmem:[%s633_s1 + $0x30] sm:$0xff] }
   0xc   :  { %v52_v33 = vld [vmem:[%s633_s1 + $0x70] sm:$0xff]  ;;  %v27_v34 = vld [vmem:[%s632_s0 + $0x38] sm:$0xff]  ;;  %v28_v37 = vld [vmem:[%s632_s0 + $0x40] sm:$0xff] }
   0xd   :  { %v45_v35 = vld [vmem:[%s633_s1 + $0x38] sm:$0xff]  ;;  %v545_v39 = vld [vmem:[%s634_s4] ss:$0 sm:$0xff] }
   0xe   :  { %344 = vmatmul.msk.f32.gmra.mxu1 %vm172_vm0, %v21_v10  ;;  %v53_v36 = vld [vmem:[%s633_s1 + $0x78] sm:$0xff] }
   0xf   :  { %353 = vmatmul.msk.f32.gmra.mxu3 %vm172_vm0, %v30_v11 }
  0x11   :  { %328 = vmatmul.msk.f32.gmra.mxu0 %vm58_vm1, %v39_v12 }
  0x12   :  { %336 = vmatmul.msk.f32.gmra.mxu2 %vm58_vm1, %v47_v13 }
  0x16   :  { %345 = vmatmul.msk.f32.gmra.mxu1 %vm172_vm0, %v22_v14 }
  0x17   :  { %354 = vmatmul.msk.f32.gmra.mxu3 %vm172_vm0, %v31_v15 }
  0x19   :  { %329 = vmatmul.msk.f32.gmra.mxu0 %vm58_vm1, %v40_v16 }
  0x1a   :  { %337 = vmatmul.msk.f32.gmra.mxu2 %vm58_vm1, %v48_v17 }
  0x1e   :  { %346 = vmatmul.msk.f32.gmra.mxu1 %vm172_vm0, %v23_v18 }
  0x1f   :  { %355 = vmatmul.msk.f32.gmra.mxu3 %vm172_vm0, %v32_v19 }
  0x21   :  { %330 = vmatmul.msk.f32.gmra.mxu0 %vm58_vm1, %v41_v20 }
  0x22   :  { %338 = vmatmul.msk.f32.gmra.mxu2 %vm58_vm1, %v49_v21 }
  0x26   :  { %347 = vmatmul.msk.f32.gmra.mxu1 %vm172_vm0, %v24_v22 }
  0x27   :  { %356 = vmatmul.msk.f32.gmra.mxu3 %vm172_vm0, %v33_v23 }
  0x29   :  { %331 = vmatmul.msk.f32.gmra.mxu0 %vm58_vm1, %v42_v24 }
  0x2a   :  { %339 = vmatmul.msk.f32.gmra.mxu2 %vm58_vm1, %v50_v25 }
  0x2e   :  { %348 = vmatmul.msk.f32.gmra.mxu1 %vm172_vm0, %v25_v26 }
  0x2f   :  { %357 = vmatmul.msk.f32.gmra.mxu3 %vm172_vm0, %v34_v27 }
  0x31   :  { %332 = vmatmul.msk.f32.gmra.mxu0 %vm58_vm1, %v43_v28 }
  0x32   :  { %340 = vmatmul.msk.f32.gmra.mxu2 %vm58_vm1, %v51_v29 }
  0x36   :  { %349 = vmatmul.msk.f32.gmra.mxu1 %vm172_vm0, %v26_v30 }
  0x37   :  { %358 = vmatmul.msk.f32.gmra.mxu3 %vm172_vm0, %v35_v31 }
  0x39   :  { %333 = vmatmul.msk.f32.gmra.mxu0 %vm58_vm1, %v44_v32 }
  0x3a   :  { %341 = vmatmul.msk.f32.gmra.mxu2 %vm58_vm1, %v52_v33 }
  0x3e   :  { %350 = vmatmul.msk.f32.gmra.mxu1 %vm172_vm0, %v27_v34 }
  0x41   :  { %334 = vmatmul.msk.f32.gmra.mxu0 %vm58_vm1, %v45_v35 }
  0x42   :  { %342 = vmatmul.msk.f32.gmra.mxu2 %vm58_vm1, %v53_v36 }
  0x46   :  { %351 = vmatmul.msk.f32.gmra.mxu1 %vm172_vm0, %v28_v37 }
  0x83   :  { %v238_v38 = vpop.f32.mrf.mxu1 }
  0x86   :  { %v124_v40 = vpop.f32.mrf.mxu0 }
  0x87   :  { %v239_v41 = vadd.f32 %v238_v38, %v124_v40 }
  0x89   :  { %v290_v42 = vadd.f32 %v545_v39, %v239_v41 }
  0x8a   :  { %v265_v43 = vpop.f32.mrf.mxu3 }
  0x8b   :  { %307 = vst.msk [vmem:[%s635_s5] sm:$0xff] %vm306_vm2, %v290_v42  ;;  %v241_v44 = vpop.f32.mrf.mxu1 }
  0x8d   :  { %v552_v45 = vpop.f32.mrf.mxu2 }
  0x8e   :  { %v127_v46 = vpop.f32.mrf.mxu0 }
  0x8f   :  { %v242_v47 = vadd.f32 %v241_v44, %v127_v46 }
  0x91   :  { %v291_v48 = vadd.f32 %v545_v39, %v242_v47 }
  0x92   :  { %v268_v49 = vpop.f32.mrf.mxu3 }
  0x93   :  { %308 = vst.msk [vmem:[%s635_s5 + $0x8] sm:$0xff] %vm306_vm2, %v291_v48  ;;  %v244_v50 = vpop.f32.mrf.mxu1 }
  0x95   :  { %v151_v51 = vpop.f32.mrf.mxu2 }
  0x96   :  { %v266_v52 = vadd.f32 %v265_v43, %v151_v51  ;;  %v130_v53 = vpop.f32.mrf.mxu0 }
  0x97   :  { %v245_v54 = vadd.f32 %v244_v50, %v130_v53 }
  0x98   :  { %v299_v55 = vadd.f32 %v545_v39, %v266_v52 }
  0x99   :  { %v292_v56 = vadd.f32 %v545_v39, %v245_v54 }
  0x9a   :  { %316 = vst.msk [vmem:[%s635_s5 + $0x48] sm:$0xff] %vm306_vm2, %v299_v55  ;;  %v271_v58 = vpop.f32.mrf.mxu3 }
  0x9b   :  { %309 = vst.msk [vmem:[%s635_s5 + $0x10] sm:$0xff] %vm306_vm2, %v292_v56  ;;  %v247_v57 = vpop.f32.mrf.mxu1 }
  0x9d   :  { %v154_v59 = vpop.f32.mrf.mxu2 }
  0x9e   :  { %v269_v60 = vadd.f32 %v268_v49, %v154_v59  ;;  %v133_v61 = vpop.f32.mrf.mxu0 }
  0x9f   :  { %v248_v62 = vadd.f32 %v247_v57, %v133_v61 }
  0xa0   :  { %v300_v63 = vadd.f32 %v545_v39, %v269_v60 }
  0xa1   :  { %v293_v0 = vadd.f32 %v545_v39, %v248_v62 }
  0xa2   :  { %317 = vst.msk [vmem:[%s635_s5 + $0x50] sm:$0xff] %vm306_vm2, %v300_v63  ;;  %v274_v3 = vpop.f32.mrf.mxu3 }
  0xa3   :  { %310 = vst.msk [vmem:[%s635_s5 + $0x18] sm:$0xff] %vm306_vm2, %v293_v0  ;;  %v250_v1 = vpop.f32.mrf.mxu1 }
  0xa5   :  { %v157_v2 = vpop.f32.mrf.mxu2 }
  0xa6   :  { %v272_v4 = vadd.f32 %v271_v58, %v157_v2  ;;  %v136_v5 = vpop.f32.mrf.mxu0 }
  0xa7   :  { %v251_v6 = vadd.f32 %v250_v1, %v136_v5 }
  0xa8   :  { %v301_v7 = vadd.f32 %v545_v39, %v272_v4 }
  0xa9   :  { %v294_v8 = vadd.f32 %v545_v39, %v251_v6 }
  0xaa   :  { %318 = vst.msk [vmem:[%s635_s5 + $0x58] sm:$0xff] %vm306_vm2, %v301_v7  ;;  %v277_v14 = vpop.f32.mrf.mxu3 }
  0xab   :  { %311 = vst.msk [vmem:[%s635_s5 + $0x20] sm:$0xff] %vm306_vm2, %v294_v8  ;;  %v253_v9 = vpop.f32.mrf.mxu1 }
  0xad   :  { %v160_v10 = vpop.f32.mrf.mxu2 }
  0xae   :  { %v275_v11 = vadd.f32 %v274_v3, %v160_v10  ;;  %v139_v12 = vpop.f32.mrf.mxu0 }
  0xaf   :  { %v254_v13 = vadd.f32 %v253_v9, %v139_v12 }
  0xb0   :  { %v302_v15 = vadd.f32 %v545_v39, %v275_v11 }
  0xb1   :  { %v295_v16 = vadd.f32 %v545_v39, %v254_v13 }
  0xb2   :  { %319 = vst.msk [vmem:[%s635_s5 + $0x60] sm:$0xff] %vm306_vm2, %v302_v15  ;;  %v280_v24 = vpop.f32.mrf.mxu3 }
  0xb3   :  { %312 = vst.msk [vmem:[%s635_s5 + $0x28] sm:$0xff] %vm306_vm2, %v295_v16  ;;  %v256_v17 = vpop.f32.mrf.mxu1 }
  0xb5   :  { %v163_v18 = vpop.f32.mrf.mxu2 }
  0xb6   :  { %v278_v19 = vadd.f32 %v277_v14, %v163_v18  ;;  %v142_v20 = vpop.f32.mrf.mxu0 }
  0xb7   :  { %v257_v21 = vadd.f32 %v256_v17, %v142_v20 }
  0xb8   :  { %v303_v22 = vadd.f32 %v545_v39, %v278_v19 }
  0xb9   :  { %v296_v23 = vadd.f32 %v545_v39, %v257_v21 }
  0xba   :  { %320 = vst.msk [vmem:[%s635_s5 + $0x68] sm:$0xff] %vm306_vm2, %v303_v22  ;;  %v283_v33 = vpop.f32.mrf.mxu3 }
  0xbb   :  { %313 = vst.msk [vmem:[%s635_s5 + $0x30] sm:$0xff] %vm306_vm2, %v296_v23  ;;  %v259_v25 = vpop.f32.mrf.mxu1 }
  0xbd   :  { %v166_v26 = vpop.f32.mrf.mxu2 }
  0xbe   :  { %v281_v27 = vadd.f32 %v280_v24, %v166_v26  ;;  %v145_v28 = vpop.f32.mrf.mxu0 }
  0xbf   :  { %v260_v29 = vadd.f32 %v259_v25, %v145_v28 }
  0xc0   :  { %v304_v30 = vadd.f32 %v545_v39, %v281_v27 }
  0xc1   :  { %v297_v31 = vadd.f32 %v545_v39, %v260_v29 }
  0xc2   :  { %321 = vst.msk [vmem:[%s635_s5 + $0x70] sm:$0xff] %vm306_vm2, %v304_v30 }
  0xc3   :  { %314 = vst.msk [vmem:[%s635_s5 + $0x38] sm:$0xff] %vm306_vm2, %v297_v31  ;;  %v262_v32 = vpop.f32.mrf.mxu1 }
  0xc4   :  { %v263_v34 = vadd.f32 %v262_v32, %v552_v45 }
  0xc5   :  { %v169_v35 = vpop.f32.mrf.mxu2 }
  0xc6   :  { %v298_v36 = vadd.f32 %v545_v39, %v263_v34  ;;  %v284_v37 = vadd.f32 %v283_v33, %v169_v35 }
  0xc8   :  { %315 = vst.msk [vmem:[%s635_s5 + $0x40] sm:$0xff] %vm306_vm2, %v298_v36  ;;  %v305_v38 = vadd.f32 %v545_v39, %v284_v37 }
  0xca   :  { %322 = vst.msk [vmem:[%s635_s5 + $0x78] sm:$0xff] %vm306_vm2, %v305_v38 }

</bundles_post_ra>
